<compile_context>
chip_gen: v5e
topology: v5e:2x2
jax: 0.10.0
libtpu: 0.0.40
codegen_flags: <defaults>
</compile_context>

<pallas_src>
import jax
import jax.numpy as jnp
from jax.experimental import pallas as pl
from jax.experimental.pallas import tpu as pltpu

LANES = 1024             # 8 * 128 -> lane-dense, unmasked full-width stores
MAX_BLOCK_ROWS = 2048    # (2048, 1024) f32 block = 8 MiB per buffer
MIN_GRID_STEPS = 4       # 2 TensorCores (v7x) x >= 2 steps each
VMEM_LIMIT_BYTES = 48 << 20   # 32 MiB live at max block + headroom


def _round_up(x, m):
    return (x + m - 1) // m * m


def _mish_kernel(x_ref, o_ref):
    # f32 math even for bf16/f16 inputs (Python float literals don't promote,
    # and v5e's VPU/EUP have no bf16 anyway).
    x = x_ref[...].astype(jnp.float32)
    # mish(x) = x * tanh(softplus(x)) = x * (u^2 - 1) / (u^2 + 1), u = 1 + e^x
    # exp arg clamped at 20: tanh(softplus(x)) == 1 to f32 precision there,
    # and exp(20)^2 ~ 2.4e17 is far from f32 overflow.
    u = 1.0 + jnp.exp(jnp.minimum(x, 20.0))
    s = u * u
    d = s + 1.0
    r = pl.reciprocal(d, approx=True)
    r = r * (2.0 - d * r)          # one Newton step: ~f32-exact, pure VPU
    o_ref[...] = (x * (s - 1.0) * r).astype(o_ref.dtype)


def _mish_jnp(x):
    """Tiny-tail / sub-1024-element fallback (same formula, pure jnp)."""
    x32 = x.astype(jnp.float32)
    u = 1.0 + jnp.exp(jnp.minimum(x32, 20.0))
    s = u * u
    return (x32 * (s - 1.0) / (s + 1.0)).astype(x.dtype)


def mish_pallas(x):
    """Elementwise mish(x) via a tiled, lane-dense Pallas TPU kernel."""
    shape, dtype = x.shape, x.dtype
    flat = x.reshape(-1)
    n = flat.shape[0]

    rows = n // LANES
    n_bulk = rows * LANES
    if rows == 0:                       # < 1024 elements: not worth a kernel
        return _mish_jnp(flat).reshape(shape)

    # Sublane packing granularity: 8 (f32) / 16 (bf16, f16) / 32 (int8, fp8).
    itemsize = jnp.dtype(dtype).itemsize
    sub = 8 * max(1, 4 // max(itemsize, 1))

    # Biggest block that still yields >= MIN_GRID_STEPS grid steps, capped at
    # MAX_BLOCK_ROWS; a single full-extent block for tiny row counts
    # (block_shape equal to the full dim is always legal).
    block_rows = min(MAX_BLOCK_ROWS,
                     _round_up(pl.cdiv(rows, MIN_GRID_STEPS), sub))
    if block_rows >= rows:
        block_rows = rows
    num_blocks = pl.cdiv(rows, block_rows)   # boundary block masked by Pallas

    if n_bulk == n:
        x2d = flat.reshape(rows, LANES)      # free: contiguous reshape
    else:
        x2d = flat[:n_bulk].reshape(rows, LANES)

    out2d = pl.pallas_call(
        _mish_kernel,
        out_shape=jax.ShapeDtypeStruct((rows, LANES), dtype),
        grid=(num_blocks,),
        in_specs=[pl.BlockSpec((block_rows, LANES), lambda i: (i, 0))],
        out_specs=pl.BlockSpec((block_rows, LANES), lambda i: (i, 0)),
        compiler_params=pltpu.CompilerParams(
            dimension_semantics=("parallel",),
            vmem_limit_bytes=VMEM_LIMIT_BYTES),
    )(x2d)

    if n_bulk == n:                      # aligned fast path: zero extra copies
        return out2d.reshape(shape)
    tail = _mish_jnp(flat[n_bulk:])      # < 1024-element remainder
    return jnp.concatenate([out2d.reshape(-1), tail]).reshape(shape)


class Mish:
    """Mirror of the PyTorch nn.Module (stateless)."""

    def __call__(self, x):
        return mish_pallas(x)


def _ref_mish(x):
    return x * jnp.tanh(jax.nn.softplus(x))


if __name__ == "__main__":
    key = jax.random.PRNGKey(0)
    x = jax.random.normal(key, (2, 4, 16, 16), jnp.float32)

    fwd = jax.jit(mish_pallas)
    out = jax.block_until_ready(fwd(x))

    assert out.shape == x.shape and out.dtype == x.dtype
    assert bool(jnp.all(jnp.isfinite(out)))
    assert bool(jnp.allclose(out, _ref_mish(x), atol=1e-3, rtol=1e-3))

    # Scaled input with a row count that forces a masked boundary block
    # (rows=60, block_rows=16 -> 4 grid steps, last one partial) and exercises
    # the exp clamp / negative-saturation branches.
    x2 = 10.0 * jax.random.normal(jax.random.PRNGKey(1), (5, 3, 64, 64),
                                  jnp.float32)
    out2 = jax.block_until_ready(fwd(x2))
    assert bool(jnp.all(jnp.isfinite(out2)))
    assert bool(jnp.allclose(out2, _ref_mish(x2), atol=1e-3, rtol=1e-3))

    # Ragged (non-1024-multiple) element count: bulk kernel + jnp tail path.
    x3 = jax.random.normal(jax.random.PRNGKey(2), (3, 5, 37, 29), jnp.float32)
    out3 = jax.block_until_ready(fwd(x3))
    assert out3.shape == x3.shape
    assert bool(jnp.allclose(out3, _ref_mish(x3), atol=1e-3, rtol=1e-3))

    # bf16 input: in-kernel f32 upcast path (only bf16 output rounding left).
    x4 = jax.random.normal(jax.random.PRNGKey(3), (2, 4, 16, 16),
                           jnp.float32).astype(jnp.bfloat16)
    out4 = jax.block_until_ready(fwd(x4))
    assert out4.dtype == jnp.bfloat16
    assert bool(jnp.allclose(out4.astype(jnp.float32),
                             _ref_mish(x4.astype(jnp.float32)),
                             atol=2e-2, rtol=2e-2))

    print("KERNEL_OK")
</pallas_src>

<mosaic_0001>
module attributes {stable_mosaic.version = 11 : i64} {
  func.func @_mish_kernel(%arg0: i32, %arg1: memref<2x1024xf32, #tpu.memory_space<vmem>>, %arg2: memref<2x1024xf32, #tpu.memory_space<vmem>>) attributes {dimension_semantics = [#tpu.dimension_semantics<parallel>], iteration_bounds = array<i64: 1>, scalar_prefetch = 0 : i64, scratch_operands = 0 : i64, tpu.core_type = #tpu.core_type<tc>, window_params = [{transform_indices = @transform_0, window_bounds = array<i64: 2, 1024>}, {transform_indices = @transform_1, window_bounds = array<i64: 2, 1024>}]} {
    %c0 = arith.constant 0 : index
    %c0_0 = arith.constant 0 : index
    %0 = vector.load %arg1[%c0, %c0_0] : memref<2x1024xf32, #tpu.memory_space<vmem>>, vector<2x1024xf32>
    %cst = arith.constant 2.000000e+01 : f32
    %1 = vector.broadcast %cst : f32 to vector<2x1024xf32>
    %2 = arith.minimumf %0, %1 : vector<2x1024xf32>
    %3 = math.exp %2 : vector<2x1024xf32>
    %cst_1 = arith.constant 1.000000e+00 : f32
    %4 = vector.broadcast %cst_1 : f32 to vector<2x1024xf32>
    %5 = arith.addf %4, %3 : vector<2x1024xf32>
    %6 = arith.mulf %5, %5 : vector<2x1024xf32>
    %cst_2 = arith.constant 1.000000e+00 : f32
    %7 = vector.broadcast %cst_2 : f32 to vector<2x1024xf32>
    %8 = arith.addf %6, %7 : vector<2x1024xf32>
    %9 = tpu.reciprocal %8 {approx = true} : vector<2x1024xf32> -> vector<2x1024xf32>
    %10 = arith.mulf %8, %9 : vector<2x1024xf32>
    %cst_3 = arith.constant 2.000000e+00 : f32
    %11 = vector.broadcast %cst_3 : f32 to vector<2x1024xf32>
    %12 = arith.subf %11, %10 : vector<2x1024xf32>
    %13 = arith.mulf %9, %12 : vector<2x1024xf32>
    %cst_4 = arith.constant 1.000000e+00 : f32
    %14 = vector.broadcast %cst_4 : f32 to vector<2x1024xf32>
    %15 = arith.subf %6, %14 : vector<2x1024xf32>
    %16 = arith.mulf %0, %15 : vector<2x1024xf32>
    %17 = arith.mulf %16, %13 : vector<2x1024xf32>
    %c0_5 = arith.constant 0 : index
    %c0_6 = arith.constant 0 : index
    %18 = vector.load %arg2[%c0_5, %c0_6] : memref<2x1024xf32, #tpu.memory_space<vmem>>, vector<2x1024xf32>
    tpu.vector_store %arg2[%c0_5, %c0_6], %17 {strides = array<i32>} : memref<2x1024xf32, #tpu.memory_space<vmem>>, vector<2x1024xf32>,
    return
  }
  func.func @transform_0(%arg0: i32) -> (i32, i32) {
    %c0_i32 = arith.constant 0 : i32
    %c0_i32_0 = arith.constant 0 : i32
    return %arg0, %c0_i32 : i32, i32
  }
  func.func @transform_1(%arg0: i32) -> (i32, i32) {
    %c0_i32 = arith.constant 0 : i32
    %c0_i32_0 = arith.constant 0 : i32
    return %arg0, %c0_i32 : i32, i32
  }
}

</mosaic_0001>

<bundles_post_ra>
// kernel: mish_pallas.1
= control target key start
LH: loop header
LB: loop body
LE: loop exit
PB: predicated region body
PF: predicated region fallthrough
CT: control target
= control target key end

     0   :  { %s74_s0 = inlined_call_operand.vmem [shape: f32[2,1024], index: 0, kind: input, shape index: {}]   ;;  %s75_s1 = inlined_call_operand.vmem [shape: f32[2,1024], index: 1, kind: output, shape index: {}]  }
   0x1   :  { %v8_v0 = vld [vmem:[%s74_s0] sm:$0xff]  ;;  %v9_v1 = vld [vmem:[%s74_s0 + $0x8] sm:$0xff] }
   0x2   :  { %v10_v2 = vmin.f32 %v8_v0, 20.0  ;;  %v11_v3 = vmin.f32 %v9_v1, 20.0 }
   0x4   :  { %v12_v4 = vmul.f32 1.442695, %v10_v2  ;;  %v14_v5 = vmul.f32 1.442695, %v11_v3 }
   0x6   :  { %44 = vpow2.f32 %v12_v4 }
   0x7   :  { %46 = vpow2.f32 %v14_v5 }
   0xc   :  { %v45_v6 = vpop.eup %44 }
   0xd   :  { %v47_v7 = vpop.eup %46  ;;  %v16_v8 = vadd.f32 1.0, %v45_v6 }
   0xe   :  { %v17_v9 = vadd.f32 1.0, %v47_v7 }
   0xf   :  { %v18_v10 = vmul.f32 %v16_v8, %v16_v8 }
  0x10   :  { %v19_v11 = vmul.f32 %v17_v9, %v17_v9 }
  0x11   :  { %v20_v12 = vadd.f32 1.0, %v18_v10  ;;  %v42_v14 = vadd.f32 -1.0, %v18_v10 }
  0x12   :  { %v21_v13 = vadd.f32 1.0, %v19_v11  ;;  %v43_v16 = vadd.f32 -1.0, %v19_v11 }
  0x13   :  { %48 = vrcp.f32 %v20_v12  ;;  %v32_v21 = vmul.f32 %v42_v14, %v8_v0 }
  0x14   :  { %50 = vrcp.f32 %v21_v13  ;;  %v33_v23 = vmul.f32 %v43_v16, %v9_v1 }
  0x19   :  { %v49_v15 = vpop.eup %48 }
  0x1a   :  { %v51_v17 = vpop.eup %50  ;;  %v24_v18 = vmul.f32 %v49_v15, %v20_v12 }
  0x1b   :  { %v25_v19 = vmul.f32 %v51_v17, %v21_v13 }
  0x1c   :  { %v26_v20 = vsub.f32 2.0, %v24_v18 }
  0x1d   :  { %v27_v22 = vsub.f32 2.0, %v25_v19 }
  0x1e   :  { %v28_v24 = vmul.f32 %v49_v15, %v26_v20 }
  0x1f   :  { %v29_v25 = vmul.f32 %v51_v17, %v27_v22 }
  0x20   :  { %v34_v26 = vmul.f32 %v32_v21, %v28_v24 }
  0x21   :  { %v35_v27 = vmul.f32 %v33_v23, %v29_v25 }
  0x22   :  { %36 = vst [vmem:[%s75_s1] sm:$0xff] %v34_v26 }
  0x23   :  { %37 = vst [vmem:[%s75_s1 + $0x8] sm:$0xff] %v35_v27 }

</bundles_post_ra>
